<compile_context>
chip_gen: v5e
topology: v5e:2x2
jax: 0.10.0
libtpu: 0.0.40
codegen_flags: <defaults>
</compile_context>

<pallas_src>
import jax
import jax.numpy as jnp
from jax.experimental import pallas as pl
from jax.experimental.pallas import tpu as pltpu

SIZE = 5
N_SYMBOLS = 3
IN_FEATURES = SIZE * N_SYMBOLS      # 15
IN_PAD = 16                         # feature dim padded for bf16 packing
HIDDEN = 100
HIDDEN_PAD = 128                    # lane-aligned hidden width
OUT_FEATURES = 1
ROW_TILE = 128                      # rows packed per output lane-group


def mlp_kernel(x_ref, w1_ref, w2_ref, w3_ref, w4_ref, b_ref, o_ref):
    # x_ref: (tb, 16) bf16; w1: (16,128) bf16; w2,w3: (128,128) bf16;
    # w4: (1,128) f32 (first column of the output layer); b: (4,128) f32;
    # o_ref: (1, tb/128, 128) f32 packed real outputs.
    x = x_ref[...]                                                   # bf16

    h = jnp.dot(x, w1_ref[...], preferred_element_type=jnp.float32) + b_ref[0:1, :]
    h = jnp.maximum(h, 0.0)                                          # ReLU

    h = jnp.dot(h.astype(jnp.bfloat16), w2_ref[...],
                preferred_element_type=jnp.float32) + b_ref[1:2, :]
    h = jnp.tanh(h)                                                  # Tanh (EUP)

    h = jnp.dot(h.astype(jnp.bfloat16), w3_ref[...],
                preferred_element_type=jnp.float32) + b_ref[2:3, :]
    h = jnp.maximum(h, 0.0)                                          # ReLU, (tb,128) f32

    # Final layer, packed lane-dense: contract against the single real output
    # column of W4 (VPU mul + cross-lane reduce; compute here is negligible)
    # and fold in the scalar output bias (replicated across lanes of b[3]).
    nb = o_ref.shape[1]                                              # tb // 128
    h3 = h.reshape(nb, ROW_TILE, HIDDEN_PAD)                         # layout no-op
    w4 = w4_ref[...][None, :, :]                                     # (1,1,128)
    z = jnp.sum(h3 * w4, axis=-1) + b_ref[3:4, :]                    # (nb, 128)
    # Numerically-stable sigmoid via tanh (lands on the EUP slot).
    o_ref[...] = (0.5 * (jnp.tanh(0.5 * z) + 1.0))[None]


def init_params(key):
    """PyTorch nn.Linear init U(-1/sqrt(fan_in), 1/sqrt(fan_in)).
    Returns (packed_params, (raw_w, raw_b)); packed weights are stored
    pre-transposed as (in, out), zero-padded to 128 lanes."""
    dims = [(IN_FEATURES, HIDDEN), (HIDDEN, HIDDEN),
            (HIDDEN, HIDDEN), (HIDDEN, OUT_FEATURES)]
    raw_w, raw_b = [], []
    for fan_in, fan_out in dims:
        key, kw, kb = jax.random.split(key, 3)
        bound = 1.0 / jnp.sqrt(jnp.float32(fan_in))
        raw_w.append(jax.random.uniform(kw, (fan_in, fan_out), jnp.float32, -bound, bound))
        raw_b.append(jax.random.uniform(kb, (fan_out,), jnp.float32, -bound, bound))

    w1 = (jnp.zeros((IN_PAD, HIDDEN_PAD), jnp.float32)
          .at[:IN_FEATURES, :HIDDEN].set(raw_w[0]).astype(jnp.bfloat16))
    w2 = (jnp.zeros((HIDDEN_PAD, HIDDEN_PAD), jnp.float32)
          .at[:HIDDEN, :HIDDEN].set(raw_w[1]).astype(jnp.bfloat16))
    w3 = (jnp.zeros((HIDDEN_PAD, HIDDEN_PAD), jnp.float32)
          .at[:HIDDEN, :HIDDEN].set(raw_w[2]).astype(jnp.bfloat16))
    # Final layer: ship only the single real output column, in f32.
    w4c = jnp.zeros((1, HIDDEN_PAD), jnp.float32).at[0, :HIDDEN].set(raw_w[3][:, 0])
    b = jnp.zeros((4, HIDDEN_PAD), jnp.float32)
    b = (b.at[0, :HIDDEN].set(raw_b[0])
           .at[1, :HIDDEN].set(raw_b[1])
           .at[2, :HIDDEN].set(raw_b[2])
           .at[3, :].set(raw_b[3][0]))          # scalar out-bias, lane-replicated
    return (w1, w2, w3, w4c, b), (raw_w, raw_b)


def net_forward(x, params, *, max_block_rows=4096):
    w1, w2, w3, w4c, b = params
    batch = x.shape[0]

    # Pre-cast input to bf16 and pad features 15 -> 16 (halves input DMA).
    x = jnp.pad(x, ((0, 0), (0, IN_PAD - IN_FEATURES))).astype(jnp.bfloat16)

    # Row tiling: rows are grouped in 128s (packed output), tile size is
    # ceil(batch / num_tiles) so we never pad to a power-of-two tile.  Keep the
    # grid length >= 2 (and even) when possible so v7x's two TensorCores both
    # get work under dimension_semantics=("parallel",).
    rows128 = pl.cdiv(batch, ROW_TILE)                       # 128-row groups
    num_tiles = pl.cdiv(rows128 * ROW_TILE, max_block_rows)
    if num_tiles == 1 and rows128 >= 2:
        num_tiles = 2
    if num_tiles > 1 and num_tiles % 2:
        num_tiles += 1
    groups_per_tile = pl.cdiv(rows128, num_tiles)
    tb = groups_per_tile * ROW_TILE
    padded_batch = num_tiles * tb
    if padded_batch != batch:
        x = jnp.pad(x, ((0, padded_batch - batch), (0, 0)))

    def resident(shape):
        # Constant index_map -> block never re-DMAs; weights stay VMEM-resident.
        return pl.BlockSpec(shape, lambda i: (0, 0))

    out_packed = pl.pallas_call(
        mlp_kernel,
        out_shape=jax.ShapeDtypeStruct((num_tiles, groups_per_tile, ROW_TILE),
                                       jnp.float32),
        grid=(num_tiles,),
        in_specs=[
            pl.BlockSpec((tb, IN_PAD), lambda i: (i, 0)),    # x, pipelined
            resident(w1.shape), resident(w2.shape), resident(w3.shape),
            resident(w4c.shape), resident(b.shape),
        ],
        # Packed, lane-dense output: (1, tb/128, 128) real outputs per step.
        out_specs=pl.BlockSpec((1, groups_per_tile, ROW_TILE), lambda i: (i, 0, 0)),
        compiler_params=pltpu.CompilerParams(
            dimension_semantics=("parallel",)),              # megacore on v7x
    )(x, w1, w2, w3, w4c, b)

    # Cheap reshape (no strided slice of a padded slab), then drop pad rows.
    return out_packed.reshape(-1)[:batch].reshape(batch, OUT_FEATURES)


def _ref_bf16(x, params):
    """Plain-JAX reference matching the kernel's bf16-operand / f32-accum math."""
    w1, w2, w3, w4c, b = params
    f32 = jnp.float32
    xb = jnp.pad(x, ((0, 0), (0, IN_PAD - IN_FEATURES))).astype(jnp.bfloat16)
    h = jnp.maximum(jnp.dot(xb, w1, preferred_element_type=f32) + b[0], 0.0)
    h = jnp.tanh(jnp.dot(h.astype(jnp.bfloat16), w2, preferred_element_type=f32) + b[1])
    h = jnp.maximum(jnp.dot(h.astype(jnp.bfloat16), w3, preferred_element_type=f32) + b[2], 0.0)
    z = jnp.sum(h * w4c[0][None, :], axis=-1, keepdims=True) + b[3, 0]
    return jax.nn.sigmoid(z)


def _ref_f32(x, raw_w, raw_b):
    """Full-f32 reference (original PyTorch forward semantics)."""
    h = jnp.maximum(x @ raw_w[0] + raw_b[0], 0.0)
    h = jnp.tanh(h @ raw_w[1] + raw_b[1])
    h = jnp.maximum(h @ raw_w[2] + raw_b[2], 0.0)
    return jax.nn.sigmoid(h @ raw_w[3] + raw_b[3])


if __name__ == "__main__":
    key = jax.random.PRNGKey(0)
    key, kinit = jax.random.split(key)
    params, (raw_w, raw_b) = init_params(kinit)

    # batch=8/100: single-tile (padding path); batch=520: uneven 2-tile split;
    # batch=1024: multi-tile grid / pipelining path.
    for batch in (8, 100, 520, 1024):
        key, kx = jax.random.split(key)
        x = jax.random.normal(kx, (batch, IN_FEATURES), dtype=jnp.float32)

        out = jax.block_until_ready(net_forward(x, params))
        assert out.shape == (batch, OUT_FEATURES)

        ref_bf = _ref_bf16(x, params)
        ref_f32 = _ref_f32(x, raw_w, raw_b)
        assert jnp.allclose(out, ref_bf, atol=5e-3, rtol=5e-3), \
            f"bf16-matched mismatch at batch={batch}"
        assert jnp.allclose(out, ref_f32, atol=3e-2, rtol=3e-2), \
            f"f32-semantics mismatch at batch={batch}"

    print("KERNEL_OK")
</pallas_src>

<mosaic_0001>
module attributes {stable_mosaic.version = 11 : i64} {
  func.func @mlp_kernel(%arg0: i32, %arg1: memref<128x16xbf16, #tpu.memory_space<vmem>>, %arg2: memref<16x128xbf16, #tpu.memory_space<vmem>>, %arg3: memref<128x128xbf16, #tpu.memory_space<vmem>>, %arg4: memref<128x128xbf16, #tpu.memory_space<vmem>>, %arg5: memref<1x128xf32, #tpu.memory_space<vmem>>, %arg6: memref<4x128xf32, #tpu.memory_space<vmem>>, %arg7: memref<1x1x128xf32, #tpu.memory_space<vmem>>) attributes {dimension_semantics = [#tpu.dimension_semantics<parallel>], iteration_bounds = array<i64: 1>, scalar_prefetch = 0 : i64, scratch_operands = 0 : i64, tpu.core_type = #tpu.core_type<tc>, window_params = [{transform_indices = @transform_0, window_bounds = array<i64: 128, 16>}, {pipeline_mode = #tpu.pipeline_mode<synchronous>, transform_indices = @transform_1, window_bounds = array<i64: 16, 128>}, {pipeline_mode = #tpu.pipeline_mode<synchronous>, transform_indices = @transform_2, window_bounds = array<i64: 128, 128>}, {pipeline_mode = #tpu.pipeline_mode<synchronous>, transform_indices = @transform_3, window_bounds = array<i64: 128, 128>}, {pipeline_mode = #tpu.pipeline_mode<synchronous>, transform_indices = @transform_4, window_bounds = array<i64: 1, 128>}, {pipeline_mode = #tpu.pipeline_mode<synchronous>, transform_indices = @transform_5, window_bounds = array<i64: 4, 128>}, {transform_indices = @transform_6, window_bounds = array<i64: 1, 1, 128>}]} {
    %c0 = arith.constant 0 : index
    %c0_0 = arith.constant 0 : index
    %0 = vector.load %arg1[%c0, %c0_0] : memref<128x16xbf16, #tpu.memory_space<vmem>>, vector<128x16xbf16>
    %c0_1 = arith.constant 0 : index
    %c0_2 = arith.constant 0 : index
    %1 = vector.load %arg2[%c0_1, %c0_2] : memref<16x128xbf16, #tpu.memory_space<vmem>>, vector<16x128xbf16>
    %cst = arith.constant dense<0.000000e+00> : vector<128x128xf32>
    %2 = tpu.matmul %0, %1, %cst {dimension_numbers = #tpu.dot_dimension_numbers<[1], [0], [0], [1], [0, 0, 1, 1], [], []>} : vector<128x16xbf16>, vector<16x128xbf16>, vector<128x128xf32> -> vector<128x128xf32>
    %c0_3 = arith.constant 0 : index
    %c0_4 = arith.constant 0 : index
    %3 = vector.load %arg6[%c0_3, %c0_4] : memref<4x128xf32, #tpu.memory_space<vmem>>, vector<1x128xf32>
    %4 = vector.broadcast %3 : vector<1x128xf32> to vector<128x128xf32>
    %5 = arith.addf %2, %4 : vector<128x128xf32>
    %cst_5 = arith.constant 0.000000e+00 : f32
    %6 = vector.broadcast %cst_5 : f32 to vector<128x128xf32>
    %7 = arith.maximumf %5, %6 : vector<128x128xf32>
    %8 = arith.truncf %7 : vector<128x128xf32> to vector<128x128xbf16>
    %c0_6 = arith.constant 0 : index
    %c0_7 = arith.constant 0 : index
    %9 = vector.load %arg3[%c0_6, %c0_7] : memref<128x128xbf16, #tpu.memory_space<vmem>>, vector<128x128xbf16>
    %cst_8 = arith.constant dense<0.000000e+00> : vector<128x128xf32>
    %10 = tpu.matmul %8, %9, %cst_8 {dimension_numbers = #tpu.dot_dimension_numbers<[1], [0], [0], [1], [0, 0, 1, 1], [], []>} : vector<128x128xbf16>, vector<128x128xbf16>, vector<128x128xf32> -> vector<128x128xf32>
    %c1 = arith.constant 1 : index
    %c0_9 = arith.constant 0 : index
    %11 = vector.load %arg6[%c1, %c0_9] : memref<4x128xf32, #tpu.memory_space<vmem>>, vector<1x128xf32>
    %12 = vector.broadcast %11 : vector<1x128xf32> to vector<128x128xf32>
    %13 = arith.addf %10, %12 : vector<128x128xf32>
    %14 = math.tanh %13 : vector<128x128xf32>
    %15 = arith.truncf %14 : vector<128x128xf32> to vector<128x128xbf16>
    %c0_10 = arith.constant 0 : index
    %c0_11 = arith.constant 0 : index
    %16 = vector.load %arg4[%c0_10, %c0_11] : memref<128x128xbf16, #tpu.memory_space<vmem>>, vector<128x128xbf16>
    %cst_12 = arith.constant dense<0.000000e+00> : vector<128x128xf32>
    %17 = tpu.matmul %15, %16, %cst_12 {dimension_numbers = #tpu.dot_dimension_numbers<[1], [0], [0], [1], [0, 0, 1, 1], [], []>} : vector<128x128xbf16>, vector<128x128xbf16>, vector<128x128xf32> -> vector<128x128xf32>
    %c2 = arith.constant 2 : index
    %c0_13 = arith.constant 0 : index
    %18 = vector.load %arg6[%c2, %c0_13] : memref<4x128xf32, #tpu.memory_space<vmem>>, vector<1x128xf32>
    %19 = vector.broadcast %18 : vector<1x128xf32> to vector<128x128xf32>
    %20 = arith.addf %17, %19 : vector<128x128xf32>
    %cst_14 = arith.constant 0.000000e+00 : f32
    %21 = vector.broadcast %cst_14 : f32 to vector<128x128xf32>
    %22 = arith.maximumf %20, %21 : vector<128x128xf32>
    %23 = vector.shape_cast %22 : vector<128x128xf32> to vector<1x128x128xf32>
    %c0_15 = arith.constant 0 : index
    %c0_16 = arith.constant 0 : index
    %24 = vector.load %arg5[%c0_15, %c0_16] : memref<1x128xf32, #tpu.memory_space<vmem>>, vector<1x128xf32>
    %25 = vector.shape_cast %24 : vector<1x128xf32> to vector<1x1x128xf32>
    %26 = vector.broadcast %25 : vector<1x1x128xf32> to vector<1x128x128xf32>
    %27 = arith.mulf %23, %26 : vector<1x128x128xf32>
    %cst_17 = arith.constant dense<0.000000e+00> : vector<1x128xf32>
    %28 = vector.multi_reduction <add>, %27, %cst_17 [2] : vector<1x128x128xf32> to vector<1x128xf32>
    %c3 = arith.constant 3 : index
    %c0_18 = arith.constant 0 : index
    %29 = vector.load %arg6[%c3, %c0_18] : memref<4x128xf32, #tpu.memory_space<vmem>>, vector<1x128xf32>
    %30 = arith.addf %28, %29 : vector<1x128xf32>
    %cst_19 = arith.constant 5.000000e-01 : f32
    %31 = vector.broadcast %cst_19 : f32 to vector<1x128xf32>
    %32 = arith.mulf %31, %30 : vector<1x128xf32>
    %33 = math.tanh %32 : vector<1x128xf32>
    %cst_20 = arith.constant 1.000000e+00 : f32
    %34 = vector.broadcast %cst_20 : f32 to vector<1x128xf32>
    %35 = arith.addf %33, %34 : vector<1x128xf32>
    %cst_21 = arith.constant 5.000000e-01 : f32
    %36 = vector.broadcast %cst_21 : f32 to vector<1x128xf32>
    %37 = arith.mulf %36, %35 : vector<1x128xf32>
    %38 = vector.shape_cast %37 : vector<1x128xf32> to vector<1x1x128xf32>
    %c0_22 = arith.constant 0 : index
    %c0_23 = arith.constant 0 : index
    %c0_24 = arith.constant 0 : index
    %39 = vector.load %arg7[%c0_22, %c0_23, %c0_24] : memref<1x1x128xf32, #tpu.memory_space<vmem>>, vector<1x1x128xf32>
    tpu.vector_store %arg7[%c0_22, %c0_23, %c0_24], %38 {strides = array<i32>} : memref<1x1x128xf32, #tpu.memory_space<vmem>>, vector<1x1x128xf32>,
    return
  }
  func.func @transform_0(%arg0: i32) -> (i32, i32) {
    %c0_i32 = arith.constant 0 : i32
    %c0_i32_0 = arith.constant 0 : i32
    return %arg0, %c0_i32 : i32, i32
  }
  func.func @transform_1(%arg0: i32) -> (i32, i32) {
    %c0_i32 = arith.constant 0 : i32
    %c0_i32_0 = arith.constant 0 : i32
    %c0_i32_1 = arith.constant 0 : i32
    return %c0_i32, %c0_i32_0 : i32, i32
  }
  func.func @transform_2(%arg0: i32) -> (i32, i32) {
    %c0_i32 = arith.constant 0 : i32
    %c0_i32_0 = arith.constant 0 : i32
    %c0_i32_1 = arith.constant 0 : i32
    return %c0_i32, %c0_i32_0 : i32, i32
  }
  func.func @transform_3(%arg0: i32) -> (i32, i32) {
    %c0_i32 = arith.constant 0 : i32
    %c0_i32_0 = arith.constant 0 : i32
    %c0_i32_1 = arith.constant 0 : i32
    return %c0_i32, %c0_i32_0 : i32, i32
  }
  func.func @transform_4(%arg0: i32) -> (i32, i32) {
    %c0_i32 = arith.constant 0 : i32
    %c0_i32_0 = arith.constant 0 : i32
    %c0_i32_1 = arith.constant 0 : i32
    return %c0_i32, %c0_i32_0 : i32, i32
  }
  func.func @transform_5(%arg0: i32) -> (i32, i32) {
    %c0_i32 = arith.constant 0 : i32
    %c0_i32_0 = arith.constant 0 : i32
    %c0_i32_1 = arith.constant 0 : i32
    return %c0_i32, %c0_i32_0 : i32, i32
  }
  func.func @transform_6(%arg0: i32) -> (i32, i32, i32) {
    %c0_i32 = arith.constant 0 : i32
    %c0_i32_0 = arith.constant 0 : i32
    %c0_i32_1 = arith.constant 0 : i32
    return %arg0, %c0_i32, %c0_i32_0 : i32, i32, i32
  }
}

</mosaic_0001>

<bundles_post_ra>
// kernel: tpu_custom_call.1
= control target key start
LH: loop header
LB: loop body
LE: loop exit
PB: predicated region body
PF: predicated region fallthrough
CT: control target
= control target key end

     0   :  { %11 = vsyncpa [#allocation3], 0  ;;  %s1468_s0 = inlined_call_operand.vmem [shape: bf16[128,16], index: 0, kind: input, shape index: {}]   ;;  %s1469_s1 = inlined_call_operand.vmem [shape: bf16[16,128], index: 1, kind: input, shape index: {}]   ;;  %s1470_s2 = inlined_call_operand.vmem [shape: bf16[128,128], index: 2, kind: input, shape index: {}]   ;;  %s1471_s3 = inlined_call_operand.hbm [shape: bf16[128,128], index: 3, kind: input, shape index: {}]   ;;  %s1472_s4 = inlined_call_operand.hbm [shape: f32[1,128], index: 4, kind: input, shape index: {}]   ;;  %s1473_s5 = inlined_call_operand.vmem [shape: f32[4,128], index: 5, kind: input, shape index: {}]   ;;  %s1474_s6 = inlined_call_operand.hbm [shape: f32[1,1,128], index: 6, kind: output, shape index: {}]  }
   0x1   :  { %12 = vsyncpa [#allocation6], 0 }
   0x2   :  { %13 = vsyncpa [#allocation4], 0  ;;  %s24_s23 = sshll.u32 %s1471_s3, 4  ;;  %s1204_s24 = smov [#allocation2]   ;;  %s25_s23 = int_to_ptr.hbm [resolvable:$true] %s24_s23 }
   0x3   :  { %s26_s25 = sshll.u32 %s1204_s24, 4  ;;  %s38_s28 = sshll.u32 %s1472_s4, 4  ;;  %s27_s25 = int_to_ptr.vmem [resolvable:$true] %s26_s25  ;;  %s39_s28 = int_to_ptr.hbm [resolvable:$true] %s38_s28 }
   0x4   :  { %s1205_s29 = smov 64   ;;  %s1206_s30 = smov 4  }
   0x5   :  { %32 = dma.hbm_to_vmem [thread:$0]  %s25_s23, 1024, %s27_s25, [#allocation3], %s1205_s29, %s1205_s29, %s1206_s30  }
   0x6   :  { %s1207_s7 = smov [#allocation5]  }
   0x7   :  { %s40_s8 = sshll.u32 %s1207_s7, 4  ;;  %s41_s8 = int_to_ptr.vmem [resolvable:$true] %s40_s8 }
   0x8   :  { %43 = dma.hbm_to_vmem [thread:$0]  %s39_s28, 16, %s41_s8, [#allocation6]  }
   0x9   :  { %1198 = dma.done.wait [#allocation3], 1024  }
   0xa   :  { %1199 = vsyncadd [#allocation3], 4294966272 }
   0xb   :  { %1200 = dma.done.wait [#allocation6], 16  }
   0xc   :  { %1201 = vsyncadd [#allocation6], 4294967280  ;;  %v999_v0 = vld [vmem:[%s1469_s1] sm:$0xff]  ;;  %vm121_vm0 = vcmask 130048   ;;  %v992_v2 = vld [vmem:[%s1468_s0 + $0x8] sm:$0xff]  ;;  %vm805_vm1 = vcmask 130112  }
   0xd   :  { %v991_v1 = vld [vmem:[%s1468_s0] sm:$0xff]  ;;  %153 = vmatpush.bf16.msra.mxu0 %v999_v0  ;;  %v993_v3 = vld [vmem:[%s1468_s0 + $0x10] sm:$0xff]  ;;  %v994_v4 = vld [vmem:[%s1468_s0 + $0x18] sm:$0xff]  ;;  %vm809_vm2 = vcmask 195712   ;;  %vm813_vm3 = vcmask 261312   ;;  %vm817_vm4 = vcmask 326912  }
   0xe   :  { %v995_v5 = vld [vmem:[%s1468_s0 + $0x20] sm:$0xff]  ;;  %v1007_v6 = vld [vmem:[%s1470_s2 + $0x38] sm:$0xff]  ;;  %v996_v7 = vld [vmem:[%s1468_s0 + $0x28] sm:$0xff]  ;;  %vm821_vm5 = vcmask 392512   ;;  %vm825_vm6 = vcmask 458112   ;;  %vm829_vm7 = vcmask 523712  }
   0xf   :  { %285 = vmatpush.bf16.msra.mxu1 %v1007_v6  ;;  %1016 = vmatpush.bf16.msra.mxu3 %v1007_v6  ;;  %v1006_v8 = vld [vmem:[%s1470_s2 + $0x30] sm:$0xff]  ;;  %v1005_v9 = vld [vmem:[%s1470_s2 + $0x28] sm:$0xff]  ;;  %v1004_v10 = vld [vmem:[%s1470_s2 + $0x20] sm:$0xff]  ;;  %vm833_vm8 = vcmask 589312   ;;  %vm837_vm9 = vcmask 654912   ;;  %vm841_vm10 = vcmask 720512  }
  0x10   :  { %919 = vmatmul.msk.bf16.vlgmr.msra.gmra.mxu0 %vm121_vm0, %v991_v1  ;;  %v1003_v11 = vld [vmem:[%s1470_s2 + $0x18] sm:$0xff]  ;;  %v997_v12 = vld [vmem:[%s1468_s0 + $0x30] sm:$0xff]  ;;  %v1001_v14 = vld [vmem:[%s1470_s2 + $0x8] sm:$0xff]  ;;  %vm845_vm11 = vcmask 786112   ;;  %vm849_vm12 = vcmask 851712   ;;  %vm853_vm13 = vcmask 917312  }
  0x11   :  { %v1002_v13 = vld [vmem:[%s1470_s2 + $0x10] sm:$0xff]  ;;  %v1000_v15 = vld [vmem:[%s1470_s2] sm:$0xff]  ;;  %v998_v16 = vld [vmem:[%s1468_s0 + $0x38] sm:$0xff]  ;;  %vm857_vm14 = vcmask 982912   ;;  %s872_s22 = sshll.u32 %s1474_s6, 4  ;;  %vm861_vm15 = vcmask 1048512   ;;  %s873_s22 = int_to_ptr.hbm [resolvable:$true] %s872_s22 }
  0x12   :  { %v1313_v18 = vld [vmem:[%s1473_s5] ss:$0 sm:$0xff]  ;;  %v1015_v60 = vld [vmem:[#allocation2 + $0x38] sm:$0xff]  ;;  %v1014_v62 = vld [vmem:[#allocation2 + $0x30] sm:$0xff] }
  0x13   :  { %286 = vmatpush.bf16.msra.mxu1 %v1006_v8  ;;  %1017 = vmatpush.bf16.msra.mxu3 %v1006_v8  ;;  %v1013_v63 = vld [vmem:[#allocation2 + $0x28] sm:$0xff] }
  0x14   :  { %424 = vmatpush.bf16.msra.mxu2 %v1015_v60 }
  0x17   :  { %287 = vmatpush.bf16.msra.mxu1 %v1005_v9  ;;  %1018 = vmatpush.bf16.msra.mxu3 %v1005_v9  ;;  %v1010_v9 = vld [vmem:[#allocation2 + $0x10] sm:$0xff] }
  0x18   :  { %425 = vmatpush.bf16.msra.mxu2 %v1014_v62 }
  0x1b   :  { %288 = vmatpush.bf16.msra.mxu1 %v1004_v10  ;;  %1019 = vmatpush.bf16.msra.mxu3 %v1004_v10 }
  0x1c   :  { %426 = vmatpush.bf16.msra.mxu2 %v1013_v63 }
  0x1f   :  { %289 = vmatpush.bf16.msra.mxu1 %v1003_v11  ;;  %1020 = vmatpush.bf16.msra.mxu3 %v1003_v11  ;;  %v1009_v11 = vld [vmem:[#allocation2 + $0x8] sm:$0xff] }
  0x20   :  { %920 = vmatmul.msk.bf16.gmra.mxu0 %vm121_vm0, %v992_v2 }
  0x23   :  { %290 = vmatpush.bf16.msra.mxu1 %v1002_v13  ;;  %1021 = vmatpush.bf16.msra.mxu3 %v1002_v13 }
  0x27   :  { %291 = vmatpush.bf16.msra.mxu1 %v1001_v14  ;;  %1022 = vmatpush.bf16.msra.mxu3 %v1001_v14 }
  0x2b   :  { %292 = vmatpush.bf16.msra.mxu1 %v1000_v15  ;;  %1023 = vmatpush.bf16.msra.mxu3 %v1000_v15 }
  0x2f   :  { %1024 = vmatpush.bf16.msrb.mxu3 %v1015_v60 }
  0x30   :  { %921 = vmatmul.msk.bf16.gmra.mxu0 %vm121_vm0, %v993_v3 }
  0x33   :  { %1025 = vmatpush.bf16.msrb.mxu3 %v1014_v62 }
  0x37   :  { %1026 = vmatpush.bf16.msrb.mxu3 %v1013_v63 }
  0x40   :  { %922 = vmatmul.msk.bf16.gmra.mxu0 %vm121_vm0, %v994_v4 }
  0x50   :  { %923 = vmatmul.msk.bf16.gmra.mxu0 %vm121_vm0, %v995_v5  ;;  %v1012_v5 = vld [vmem:[#allocation2 + $0x20] sm:$0xff] }
  0x51   :  { %427 = vmatpush.bf16.msra.mxu2 %v1012_v5  ;;  %1027 = vmatpush.bf16.msrb.mxu3 %v1012_v5 }
  0x60   :  { %924 = vmatmul.msk.bf16.gmra.mxu0 %vm121_vm0, %v996_v7  ;;  %v1011_v7 = vld [vmem:[#allocation2 + $0x18] sm:$0xff] }
  0x61   :  { %428 = vmatpush.bf16.msra.mxu2 %v1011_v7  ;;  %1028 = vmatpush.bf16.msrb.mxu3 %v1011_v7 }
  0x65   :  { %429 = vmatpush.bf16.msra.mxu2 %v1010_v9  ;;  %1029 = vmatpush.bf16.msrb.mxu3 %v1010_v9 }
  0x69   :  { %430 = vmatpush.bf16.msra.mxu2 %v1009_v11  ;;  %1030 = vmatpush.bf16.msrb.mxu3 %v1009_v11 }
  0x70   :  { %925 = vmatmul.msk.bf16.gmra.mxu0 %vm121_vm0, %v997_v12 }
  0x80   :  { %926 = vmatmul.msk.bf16.gmra.mxu0 %vm121_vm0, %v998_v16  ;;  %v1008_v16 = vld [vmem:[#allocation2] sm:$0xff] }
  0x81   :  { %431 = vmatpush.bf16.msra.mxu2 %v1008_v16  ;;  %1031 = vmatpush.bf16.msrb.mxu3 %v1008_v16 }
  0x8d   :  { %v155_v17 = vpop.f32.mrf.mxu0 }
  0x8e   :  { %v156_v19 = vadd.f32 %v1313_v18, %v155_v17 }
  0x90   :  { %v195_v22 = vmax.f32 %v156_v19, 0.0 }
  0x95   :  { %v157_v20 = vpop.f32.mrf.mxu0 }
  0x96   :  { %v158_v21 = vadd.f32 %v1313_v18, %v157_v20  ;;  %v1334_v20 = vld [vmem:[%s1473_s5 + $0x1] ss:$0 sm:$0xff] }
  0x98   :  { %v196_v23 = vmax.f32 %v158_v21, 0.0 }
  0x9a   :  { %v211_v24 = vpack.c.bf16 %v196_v23, %v195_v22  ;;  %v544_v22 = vlaneseq }
  0x9c   :  { %293 = vmatmul.bf16.vlgmr.msra.gmra.mxu1 %v211_v24  ;;  %v1339_v24 = vshrl.u32 %v544_v22, 7 }
  0x9d   :  { %v160_v25 = vpop.f32.mrf.mxu0 }
  0x9e   :  { %v161_v26 = vadd.f32 %v1313_v18, %v160_v25  ;;  %1038 = vset.pattern.permute.xlu1 %v1339_v24  ;;  %v552_v25 = vadd.s32 8, %v1339_v24  ;;  %v630_v63 = vadd.s32 112, %v1339_v24  ;;  %v624_v9 = vadd.s32 104, %v1339_v24 }
  0xa0   :  { %v197_v29 = vmax.f32 %v161_v26, 0.0  ;;  %1039 = vset.pattern.permute.xlu2 %v552_v25 }
  0xa5   :  { %v162_v27 = vpop.f32.mrf.mxu0 }
  0xa6   :  { %v163_v28 = vadd.f32 %v1313_v18, %v162_v27 }
  0xa8   :  { %v198_v30 = vmax.f32 %v163_v28, 0.0 }
  0xaa   :  { %v212_v31 = vpack.c.bf16 %v198_v30, %v197_v29  ;;  %v1346_v30 = vld [vmem:[%s1473_s5 + $0x3] ss:$0 sm:$0xff] }
  0xab   :  { %548 = vperm.xlu1 %1038, %v1346_v30   ;;  %554 = vperm.xlu2 %1039, %v1346_v30  }
  0xac   :  { %298 = vmatmul.bf16.gmra.mxu1 %v212_v31 }
  0xad   :  { %v165_v32 = vpop.f32.mrf.mxu0 }
  0xae   :  { %v166_v33 = vadd.f32 %v1313_v18, %v165_v32 }
  0xb0   :  { %v199_v36 = vmax.f32 %v166_v33, 0.0 }
  0xb5   :  { %v167_v34 = vpop.f32.mrf.mxu0 }
  0xb6   :  { %v168_v35 = vadd.f32 %v1313_v18, %v167_v34  ;;  %v570_v34 = vadd.s32 32, %v1339_v24 }
  0xb8   :  { %v200_v37 = vmax.f32 %v168_v35, 0.0  ;;  %v564_v35 = vadd.s32 24, %v1339_v24  ;;  %1042 = vset.pattern.permute.xlu1 %v570_v34  ;;  %v1398_v34 = vld [vmem:[#allocation5] ss:$0 sm:$0xff] }
  0xba   :  { %v213_v38 = vpack.c.bf16 %v200_v37, %v199_v36  ;;  %1041 = vset.pattern.permute.xlu2 %v564_v35 }
  0xbc   :  { %303 = vmatmul.bf16.gmra.mxu1 %v213_v38 }
  0xbd   :  { %v170_v39 = vpop.f32.mrf.mxu0 }
  0xbe   :  { %v171_v40 = vadd.f32 %v1313_v18, %v170_v39 }
  0xc0   :  { %v201_v43 = vmax.f32 %v171_v40, 0.0  ;;  %572 = vperm.xlu1 %1042, %v1346_v30  }
  0xc2   :  { %566 = vperm.xlu2 %1041, %v1346_v30  }
  0xc5   :  { %v172_v41 = vpop.f32.mrf.mxu0 }
  0xc6   :  { %v173_v42 = vadd.f32 %v1313_v18, %v172_v41 }
  0xc8   :  { %v202_v44 = vmax.f32 %v173_v42, 0.0 }
  0xca   :  { %v214_v45 = vpack.c.bf16 %v202_v44, %v201_v43  ;;  %v558_v43 = vadd.s32 16, %v1339_v24  ;;  %v582_v44 = vadd.s32 48, %v1339_v24 }
  0xcc   :  { %308 = vmatmul.bf16.gmra.mxu1 %v214_v45  ;;  %v576_v45 = vadd.s32 40, %v1339_v24  ;;  %1040 = vset.pattern.permute.xlu0 %v558_v43 }
  0xcd   :  { %v175_v46 = vpop.f32.mrf.mxu0  ;;  %1044 = vset.pattern.permute.xlu1 %v582_v44 }
  0xce   :  { %v176_v47 = vadd.f32 %v1313_v18, %v175_v46  ;;  %1043 = vset.pattern.permute.xlu2 %v576_v45 }
  0xd0   :  { %v203_v50 = vmax.f32 %v176_v47, 0.0 }
  0xd4   :  { %560 = vperm.xlu0 %1040, %v1346_v30  }
  0xd5   :  { %v177_v48 = vpop.f32.mrf.mxu0  ;;  %584 = vperm.xlu1 %1044, %v1346_v30  }
  0xd6   :  { %v178_v49 = vadd.f32 %v1313_v18, %v177_v48  ;;  %578 = vperm.xlu2 %1043, %v1346_v30  }
  0xd8   :  { %v204_v51 = vmax.f32 %v178_v49, 0.0 }
  0xda   :  { %v215_v52 = vpack.c.bf16 %v204_v51, %v203_v50 }
  0xdc   :  { %313 = vmatmul.bf16.gmra.mxu1 %v215_v52 }
  0xdd   :  { %v180_v53 = vpop.f32.mrf.mxu0 }
  0xde   :  { %v181_v54 = vadd.f32 %v1313_v18, %v180_v53  ;;  %v600_v53 = vadd.s32 72, %v1339_v24 }
  0xe0   :  { %v205_v57 = vmax.f32 %v181_v54, 0.0  ;;  %v594_v54 = vadd.s32 64, %v1339_v24  ;;  %1047 = vset.pattern.permute.xlu0 %v600_v53 }
  0xe2   :  { %1046 = vset.pattern.permute.xlu1 %v594_v54 }
  0xe5   :  { %v182_v55 = vpop.f32.mrf.mxu0 }
  0xe6   :  { %v183_v56 = vadd.f32 %v1313_v18, %v182_v55  ;;  %v588_v55 = vadd.s32 56, %v1339_v24 }
  0xe8   :  { %v206_v58 = vmax.f32 %v183_v56, 0.0  ;;  %1045 = vset.pattern.permute.xlu2 %v588_v55  ;;  %602 = vperm.xlu0 %1047, %v1346_v30  }
  0xea   :  { %v216_v59 = vpack.c.bf16 %v206_v58, %v205_v57  ;;  %596 = vperm.xlu1 %1046, %v1346_v30  }
  0xec   :  { %318 = vmatmul.bf16.gmra.mxu1 %v216_v59 }
  0xed   :  { %v185_v61 = vpop.f32.mrf.mxu0 }
  0xee   :  { %v186_v0 = vadd.f32 %v1313_v18, %v185_v61 }
  0xf0   :  { %v207_v3 = vmax.f32 %v186_v0, 0.0  ;;  %590 = vperm.xlu2 %1045, %v1346_v30   ;;  %v612_v0 = vadd.s32 88, %v1339_v24  ;;  %1052 = vset.pattern.permute.xlu0 %v630_v63 }
  0xf2   :  { %1049 = vset.pattern.permute.xlu1 %v612_v0 }
  0xf5   :  { %v187_v1 = vpop.f32.mrf.mxu0 }
  0xf6   :  { %v188_v2 = vadd.f32 %v1313_v18, %v187_v1  ;;  %v606_v1 = vadd.s32 80, %v1339_v24 }
  0xf8   :  { %v208_v4 = vmax.f32 %v188_v2, 0.0  ;;  %1048 = vset.pattern.permute.xlu2 %v606_v1  ;;  %632 = vperm.xlu0 %1052, %v1346_v30  }
  0xfa   :  { %v217_v6 = vpack.c.bf16 %v208_v4, %v207_v3  ;;  %614 = vperm.xlu1 %1049, %v1346_v30  }
  0xfc   :  { %323 = vmatmul.bf16.vlgmr.msra.gmra.mxu3 %v217_v6 }
  0xfd   :  { %v190_v8 = vpop.f32.mrf.mxu0 }
  0xfe   :  { %v191_v10 = vadd.f32 %v1313_v18, %v190_v8 }
 0x100   :  { %v209_v14 = vmax.f32 %v191_v10, 0.0  ;;  %608 = vperm.xlu2 %1048, %v1346_v30   ;;  %v618_v10 = vadd.s32 96, %v1339_v24 }
 0x102   :  { %1051 = vset.pattern.permute.xlu1 %v624_v9 }
 0x105   :  { %v192_v12 = vpop.f32.mrf.mxu0 }
 0x106   :  { %v193_v13 = vadd.f32 %v1313_v18, %v192_v12 }
 0x108   :  { %v210_v15 = vmax.f32 %v193_v13, 0.0  ;;  %1050 = vset.pattern.permute.xlu2 %v618_v10 }
 0x10a   :  { %v218_v17 = vpack.c.bf16 %v210_v15, %v209_v14  ;;  %626 = vperm.xlu1 %1051, %v1346_v30   ;;  %v636_v15 = vadd.s32 120, %v1339_v24 }
 0x10c   :  { %328 = vmatmul.bf16.gmra.mxu3 %v218_v17 }
 0x110   :  { %620 = vperm.xlu2 %1050, %v1346_v30  }
 0x118   :  { %1053 = vset.pattern.permute.xlu2 %v636_v15 }
 0x119   :  { %v294_v19 = vpop.f32.mrf.mxu1 }
 0x11a   :  { %v295_v21 = vadd.f32 %v1334_v20, %v294_v19 }
 0x11c   :  { %1062 = vtanh.f32 %v295_v21 }
 0x11d   :  { %v549_v9 = vpop.permute.xlu1 %548 }
 0x120   :  { %638 = vperm.xlu2 %1053, %v1346_v30   ;;  %v1395_v30 = vld [vmem:[%s1473_s5 + $0x2] ss:$0 sm:$0xff]  ;;  %s1209_s5 = smov [#allocation7]  }
 0x121   :  { %v296_v23 = vpop.f32.mrf.mxu1  ;;  %s870_s19 = sshll.u32 %s1209_s5, 4  ;;  %s871_s19 = int_to_ptr.vmem [resolvable:$true] %s870_s19 }
 0x122   :  { %v297_v18 = vadd.f32 %v1334_v20, %v296_v23  ;;  %v1063_v26 = vpop.eup %1062 }
 0x124   :  { %1064 = vtanh.f32 %v297_v18 }
 0x129   :  { %v299_v27 = vpop.f32.mrf.mxu1 }
 0x12a   :  { %v1065_v28 = vpop.eup %1064  ;;  %v300_v31 = vadd.f32 %v1334_v20, %v299_v27 }
 0x12b   :  { %v350_v29 = vpack.c.bf16 %v1065_v28, %v1063_v26 }
 0x12c   :  { %1066 = vtanh.f32 %v300_v31 }
 0x12d   :  { %432 = vmatmul.bf16.vlgmr.msra.gmra.mxu2 %v350_v29 }
 0x131   :  { %v301_v32 = vpop.f32.mrf.mxu1 }
 0x132   :  { %v302_v33 = vadd.f32 %v1334_v20, %v301_v32  ;;  %v1067_v36 = vpop.eup %1066 }
 0x134   :  { %1068 = vtanh.f32 %v302_v33 }
 0x139   :  { %v304_v37 = vpop.f32.mrf.mxu1 }
 0x13a   :  { %v1069_v38 = vpop.eup %1068  ;;  %v305_v40 = vadd.f32 %v1334_v20, %v304_v37 }
 0x13b   :  { %v351_v39 = vpack.c.bf16 %v1069_v38, %v1067_v36 }
 0x13c   :  { %1070 = vtanh.f32 %v305_v40 }
 0x13d   :  { %437 = vmatmul.bf16.gmra.mxu2 %v351_v39 }
 0x141   :  { %v306_v41 = vpop.f32.mrf.mxu1 }
 0x142   :  { %v307_v42 = vadd.f32 %v1334_v20, %v306_v41  ;;  %v1071_v46 = vpop.eup %1070 }
 0x144   :  { %1072 = vtanh.f32 %v307_v42 }
 0x149   :  { %v309_v47 = vpop.f32.mrf.mxu1 }
 0x14a   :  { %v1073_v48 = vpop.eup %1072  ;;  %v310_v50 = vadd.f32 %v1334_v20, %v309_v47 }
 0x14b   :  { %v352_v49 = vpack.c.bf16 %v1073_v48, %v1071_v46 }
 0x14c   :  { %1074 = vtanh.f32 %v310_v50 }
 0x14d   :  { %442 = vmatmul.bf16.gmra.mxu2 %v352_v49 }
 0x151   :  { %v311_v51 = vpop.f32.mrf.mxu1 }
 0x152   :  { %v312_v52 = vadd.f32 %v1334_v20, %v311_v51  ;;  %v1075_v56 = vpop.eup %1074 }
 0x154   :  { %1076 = vtanh.f32 %v312_v52 }
 0x159   :  { %v314_v57 = vpop.f32.mrf.mxu1 }
 0x15a   :  { %v1077_v58 = vpop.eup %1076  ;;  %v315_v60 = vadd.f32 %v1334_v20, %v314_v57 }
 0x15b   :  { %v353_v59 = vpack.c.bf16 %v1077_v58, %v1075_v56 }
 0x15c   :  { %1078 = vtanh.f32 %v315_v60 }
 0x15d   :  { %447 = vmatmul.bf16.gmra.mxu2 %v353_v59 }
 0x161   :  { %v316_v61 = vpop.f32.mrf.mxu1 }
 0x162   :  { %v317_v62 = vadd.f32 %v1334_v20, %v316_v61  ;;  %v1079_v2 = vpop.eup %1078 }
 0x164   :  { %1080 = vtanh.f32 %v317_v62 }
 0x169   :  { %v319_v3 = vpop.f32.mrf.mxu1 }
 0x16a   :  { %v1081_v4 = vpop.eup %1080  ;;  %v320_v6 = vadd.f32 %v1334_v20, %v319_v3 }
 0x16b   :  { %v354_v5 = vpack.c.bf16 %v1081_v4, %v1079_v2 }
 0x16c   :  { %1082 = vtanh.f32 %v320_v6 }
 0x16d   :  { %452 = vmatmul.bf16.gmra.mxu2 %v354_v5 }
 0x171   :  { %v321_v7 = vpop.f32.mrf.mxu1 }
 0x172   :  { %v322_v8 = vadd.f32 %v1334_v20, %v321_v7  ;;  %v1083_v11 = vpop.eup %1082 }
 0x174   :  { %1084 = vtanh.f32 %v322_v8 }
 0x17a   :  { %v1085_v12 = vpop.eup %1084 }
 0x17b   :  { %v355_v13 = vpack.c.bf16 %v1085_v12, %v1083_v11 }
 0x17d   :  { %457 = vmatmul.bf16.gmra.mxu2 %v355_v13 }
 0x17f   :  { %v324_v14 = vpop.f32.mrf.mxu3 }
 0x180   :  { %v325_v16 = vadd.f32 %v1334_v20, %v324_v14  ;;  %v1421_v14 = vpop.permute.xlu1 %572 }
 0x182   :  { %1086 = vtanh.f32 %v325_v16 }
 0x187   :  { %v326_v17 = vpop.f32.mrf.mxu3 }
 0x188   :  { %v327_v19 = vadd.f32 %v1334_v20, %v326_v17  ;;  %v1087_v21 = vpop.eup %1086  ;;  %v561_v17 = vpop.permute.xlu0 %560 }
 0x18a   :  { %1088 = vtanh.f32 %v327_v19 }
 0x18f   :  { %v329_v23 = vpop.f32.mrf.mxu3 }
 0x190   :  { %v1089_v18 = vpop.eup %1088  ;;  %v330_v26 = vadd.f32 %v1334_v20, %v329_v23  ;;  %v1425_v23 = vpop.permute.xlu1 %584 }
 0x191   :  { %v356_v25 = vpack.c.bf16 %v1089_v18, %v1087_v21  ;;  %v555_v21 = vpop.permute.xlu2 %554 }
 0x192   :  { %1090 = vtanh.f32 %v330_v26 }
 0x193   :  { %462 = vmatmul.bf16.vlgmr.msrb.gmra.mxu3 %v356_v25  ;;  %v1427_v25 = vpop.permute.xlu0 %602 }
 0x197   :  { %v331_v27 = vpop.f32.mrf.mxu3 }
 0x198   :  { %v332_v24 = vadd.f32 %v1334_v20, %v331_v27  ;;  %v1091_v28 = vpop.eup %1090 }
 0x19a   :  { %1092 = vtanh.f32 %v332_v24  ;;  %v567_v24 = vpop.permute.xlu2 %566 }
 0x1a0   :  { %v1093_v29 = vpop.eup %1092 }
 0x1a1   :  { %v357_v31 = vpack.c.bf16 %v1093_v29, %v1091_v28  ;;  %v1431_v29 = vpop.permute.xlu1 %596 }
 0x1a3   :  { %467 = vmatmul.bf16.gmra.mxu3 %v357_v31  ;;  %v1208_v31 = vmov 0  }
 0x1a4   :  { %1054 = vset.pattern.permute.xlu1 %v1208_v31  ;;  %1055 = vset.pattern.permute.xlu2 %v1208_v31 }
 0x1a5   :  { %1056 = vset.pattern.permute.xlu0 %v1208_v31 }
 0x1b0   :  { %v433_v32 = vpop.f32.mrf.mxu2 }
 0x1b1   :  { %v434_v33 = vadd.f32 %v1395_v30, %v433_v32 }
 0x1b3   :  { %v473_v35 = vmax.f32 %v434_v33, 0.0 }
 0x1b5   :  { %v493_v36 = vmul.f32 %v1398_v34, %v473_v35  ;;  %v1434_v35 = vpop.permute.xlu0 %632 }
 0x1b7   :  { %509 = vadd.xlane.f32.xlu0 %v493_v36 }
 0x1b8   :  { %v435_v20 = vpop.f32.mrf.mxu2 }
 0x1b9   :  { %v436_v37 = vadd.f32 %v1395_v30, %v435_v20  ;;  %v579_v20 = vpop.permute.xlu2 %578 }
 0x1bb   :  { %v474_v38 = vmax.f32 %v436_v37, 0.0 }
 0x1bd   :  { %v494_v39 = vmul.f32 %v1398_v34, %v474_v38 }
 0x1bf   :  { %511 = vadd.xlane.f32.xlu0 %v494_v39  ;;  %v1437_v39 = vpop.permute.xlu1 %614 }
 0x1c0   :  { %v438_v40 = vpop.f32.mrf.mxu2 }
 0x1c1   :  { %v439_v41 = vadd.f32 %v1395_v30, %v438_v40 }
 0x1c3   :  { %v475_v42 = vmax.f32 %v439_v41, 0.0 }
 0x1c5   :  { %v495_v43 = vmul.f32 %v1398_v34, %v475_v42  ;;  %v1440_v42 = vpop.permute.xlu2 %590 }
 0x1c7   :  { %513 = vadd.xlane.f32.xlu1 %v495_v43 }
 0x1c8   :  { %v440_v44 = vpop.f32.mrf.mxu2 }
 0x1c9   :  { %v441_v45 = vadd.f32 %v1395_v30, %v440_v44 }
 0x1cb   :  { %v476_v46 = vmax.f32 %v441_v45, 0.0 }
 0x1cd   :  { %v496_v47 = vmul.f32 %v1398_v34, %v476_v46 }
 0x1cf   :  { %515 = vadd.xlane.f32.xlu1 %v496_v47 }
 0x1d0   :  { %v443_v48 = vpop.f32.mrf.mxu2 }
 0x1d1   :  { %v444_v49 = vadd.f32 %v1395_v30, %v443_v48 }
 0x1d3   :  { %v477_v50 = vmax.f32 %v444_v49, 0.0  ;;  %v1444_v49 = vpop.permute.xlu1 %626 }
 0x1d5   :  { %v497_v51 = vmul.f32 %v1398_v34, %v477_v50 }
 0x1d7   :  { %517 = vadd.xlane.f32.xlu2 %v497_v51  ;;  %v1446_v51 = vpop.permute.xlu2 %608 }
 0x1d8   :  { %v445_v52 = vpop.f32.mrf.mxu2 }
 0x1d9   :  { %v446_v53 = vadd.f32 %v1395_v30, %v445_v52 }
 0x1db   :  { %v478_v54 = vmax.f32 %v446_v53, 0.0 }
 0x1dd   :  { %v498_v55 = vmul.f32 %v1398_v34, %v478_v54 }
 0x1df   :  { %519 = vadd.xlane.f32.xlu2 %v498_v55 }
 0x1e0   :  { %v448_v56 = vpop.f32.mrf.mxu2 }
 0x1e1   :  { %v449_v57 = vadd.f32 %v1395_v30, %v448_v56 }
 0x1e3   :  { %v479_v58 = vmax.f32 %v449_v57, 0.0 }
 0x1e5   :  { %v499_v59 = vmul.f32 %v1398_v34, %v479_v58  ;;  %v1449_v58 = vpop.permute.xlu2 %620 }
 0x1e7   :  { %521 = vadd.xlane.f32.xlu0 %v499_v59 }
 0x1e8   :  { %v450_v60 = vpop.f32.mrf.mxu2 }
 0x1e9   :  { %v451_v61 = vadd.f32 %v1395_v30, %v450_v60 }
 0x1eb   :  { %v480_v62 = vmax.f32 %v451_v61, 0.0 }
 0x1ed   :  { %v500_v63 = vmul.f32 %v1398_v34, %v480_v62 }
 0x1ef   :  { %523 = vadd.xlane.f32.xlu1 %v500_v63 }
 0x1f0   :  { %v453_v0 = vpop.f32.mrf.mxu2 }
 0x1f1   :  { %v454_v1 = vadd.f32 %v1395_v30, %v453_v0  ;;  %v1451_v0 = vpop.permute.xlu2 %638 }
 0x1f3   :  { %v481_v2 = vmax.f32 %v454_v1, 0.0 }
 0x1f5   :  { %v501_v3 = vmul.f32 %v1398_v34, %v481_v2 }
 0x1f7   :  { %525 = vadd.xlane.f32.xlu2 %v501_v3 }
 0x1f8   :  { %v455_v4 = vpop.f32.mrf.mxu2 }
 0x1f9   :  { %v456_v5 = vadd.f32 %v1395_v30, %v455_v4 }
 0x1fb   :  { %v482_v6 = vmax.f32 %v456_v5, 0.0 }
 0x1fd   :  { %v502_v7 = vmul.f32 %v1398_v34, %v482_v6 }
 0x1ff   :  { %527 = vadd.xlane.f32.xlu0 %v502_v7 }
 0x200   :  { %v458_v8 = vpop.f32.mrf.mxu2 }
 0x201   :  { %v459_v10 = vadd.f32 %v1395_v30, %v458_v8 }
 0x203   :  { %v483_v11 = vmax.f32 %v459_v10, 0.0 }
 0x205   :  { %v503_v12 = vmul.f32 %v1398_v34, %v483_v11 }
 0x207   :  { %529 = vadd.xlane.f32.xlu1 %v503_v12 }
 0x208   :  { %v460_v13 = vpop.f32.mrf.mxu2 }
 0x209   :  { %v461_v15 = vadd.f32 %v1395_v30, %v460_v13 }
 0x20b   :  { %v484_v16 = vmax.f32 %v461_v15, 0.0 }
 0x20d   :  { %v504_v19 = vmul.f32 %v1398_v34, %v484_v16 }
 0x20f   :  { %531 = vadd.xlane.f32.xlu2 %v504_v19 }
 0x216   :  { %v463_v18 = vpop.f32.mrf.mxu3 }
 0x217   :  { %v464_v26 = vadd.f32 %v1395_v30, %v463_v18 }
 0x219   :  { %v485_v27 = vmax.f32 %v464_v26, 0.0 }
 0x21b   :  { %v505_v28 = vmul.f32 %v1398_v34, %v485_v27 }
 0x21d   :  { %533 = vadd.xlane.f32.xlu0 %v505_v28 }
 0x21e   :  { %v465_v32 = vpop.f32.mrf.mxu3 }
 0x21f   :  { %v466_v33 = vadd.f32 %v1395_v30, %v465_v32 }
 0x221   :  { %v486_v36 = vmax.f32 %v466_v33, 0.0 }
 0x223   :  { %v506_v37 = vmul.f32 %v1398_v34, %v486_v36 }
 0x225   :  { %535 = vadd.xlane.f32.xlu1 %v506_v37 }
 0x226   :  { %v468_v38 = vpop.f32.mrf.mxu3 }
 0x227   :  { %v469_v40 = vadd.f32 %v1395_v30, %v468_v38 }
 0x229   :  { %v487_v41 = vmax.f32 %v469_v40, 0.0 }
 0x22a   :  { %v510_v43 = vpop.xlane.xlu0 %509 }
 0x22b   :  { %v656_v44 = vadd.f32 %v549_v9, %v510_v43  ;;  %v507_v45 = vmul.f32 %v1398_v34, %v487_v41 }
 0x22d   :  { %v672_v46 = vmul.f32 0.5, %v656_v44  ;;  %537 = vadd.xlane.f32.xlu2 %v507_v45 }
 0x22e   :  { %v470_v47 = vpop.f32.mrf.mxu3 }
 0x22f   :  { %1094 = vtanh.f32 %v672_v46  ;;  %v471_v48 = vadd.f32 %v1395_v30, %v470_v47 }
 0x231   :  { %v488_v50 = vmax.f32 %v471_v48, 0.0 }
 0x232   :  { %v512_v52 = vpop.xlane.xlu0 %511 }
 0x233   :  { %v657_v53 = vadd.f32 %v555_v21, %v512_v52  ;;  %v508_v54 = vmul.f32 %v1398_v34, %v488_v50 }
 0x235   :  { %v1095_v55 = vpop.eup %1094  ;;  %v673_v56 = vmul.f32 0.5, %v657_v53  ;;  %539 = vadd.xlane.f32.xlu0 %v508_v54 }
 0x236   :  { %v704_v57 = vadd.f32 1.0, %v1095_v55 }
 0x237   :  { %1096 = vtanh.f32 %v673_v56 }
 0x238   :  { %v720_v61 = vmul.f32 0.5, %v704_v57 }
 0x23a   :  { %v514_v59 = vpop.xlane.xlu1 %513 }
 0x23b   :  { %v658_v60 = vadd.f32 %v561_v17, %v514_v59 }
 0x23d   :  { %v1097_v30 = vpop.eup %1096  ;;  %v674_v62 = vmul.f32 0.5, %v658_v60 }
 0x23e   :  { %753 = vperm.xlu1 %1054, %v720_v61   ;;  %v705_v63 = vadd.f32 1.0, %v1097_v30 }
 0x23f   :  { %1098 = vtanh.f32 %v674_v62 }
 0x240   :  { %v721_v2 = vmul.f32 0.5, %v705_v63 }
 0x242   :  { %v516_v1 = vpop.xlane.xlu1 %515 }
 0x243   :  { %v659_v34 = vadd.f32 %v567_v24, %v516_v1 }
 0x245   :  { %v1099_v3 = vpop.eup %1098  ;;  %v675_v4 = vmul.f32 0.5, %v659_v34  ;;  %756 = vperm.xlu2 %1055, %v721_v2  }
 0x246   :  { %v706_v5 = vadd.f32 1.0, %v1099_v3 }
 0x247   :  { %1100 = vtanh.f32 %v675_v4 }
 0x248   :  { %v722_v6 = vmul.f32 0.5, %v706_v5 }
 0x24a   :  { %v518_v7 = vpop.xlane.xlu2 %517  ;;  %759 = vperm.xlu1 %1054, %v722_v6  }
 0x24b   :  { %v660_v8 = vadd.f32 %v1421_v14, %v518_v7 }
 0x24d   :  { %v1101_v9 = vpop.eup %1100  ;;  %v676_v10 = vmul.f32 0.5, %v660_v8 }
 0x24e   :  { %v707_v11 = vadd.f32 1.0, %v1101_v9 }
 0x24f   :  { %1102 = vtanh.f32 %v676_v10 }
 0x250   :  { %v723_v12 = vmul.f32 0.5, %v707_v11 }
 0x252   :  { %v520_v13 = vpop.xlane.xlu2 %519  ;;  %762 = vperm.xlu0 %1056, %v723_v12  }
 0x253   :  { %v661_v15 = vadd.f32 %v579_v20, %v520_v13 }
 0x255   :  { %v1103_v16 = vpop.eup %1102  ;;  %v677_v17 = vmul.f32 0.5, %v661_v15 }
 0x256   :  { %v708_v19 = vadd.f32 1.0, %v1103_v16 }
 0x257   :  { %1104 = vtanh.f32 %v677_v17 }
 0x258   :  { %v724_v21 = vmul.f32 0.5, %v708_v19 }
 0x25a   :  { %765 = vperm.xlu2 %1055, %v724_v21   ;;  %v522_v18 = vpop.xlane.xlu0 %521 }
 0x25b   :  { %v662_v26 = vadd.f32 %v1425_v23, %v522_v18 }
 0x25d   :  { %v1105_v27 = vpop.eup %1104  ;;  %v678_v24 = vmul.f32 0.5, %v662_v26 }
 0x25e   :  { %v709_v14 = vadd.f32 1.0, %v1105_v27 }
 0x25f   :  { %1106 = vtanh.f32 %v678_v24 }
 0x260   :  { %v725_v28 = vmul.f32 0.5, %v709_v14 }
 0x262   :  { %v524_v31 = vpop.xlane.xlu1 %523  ;;  %768 = vperm.xlu1 %1054, %v725_v28  }
 0x263   :  { %v663_v32 = vadd.f32 %v1440_v42, %v524_v31  ;;  %v801_v31 = vand.u32 127, %v544_v22 }
 0x265   :  { %v1107_v33 = vpop.eup %1106  ;;  %v679_v36 = vmul.f32 0.5, %v663_v32  ;;  %v807_v32 = vadd.s32 4294967280, %v801_v31 }
 0x266   :  { %v710_v20 = vadd.f32 1.0, %v1107_v33 }
 0x267   :  { %1108 = vtanh.f32 %v679_v36  ;;  %v803_v36 = vadd.s32 4294967288, %v801_v31 }
 0x268   :  { %v726_v37 = vmul.f32 0.5, %v710_v20  ;;  %v811_v20 = vadd.s32 4294967272, %v801_v31 }
 0x26a   :  { %v526_v38 = vpop.xlane.xlu2 %525  ;;  %771 = vperm.xlu2 %1055, %v726_v37  }
 0x26b   :  { %v664_v40 = vadd.f32 %v1431_v29, %v526_v38 }
 0x26d   :  { %v1109_v41 = vpop.eup %1108  ;;  %v680_v23 = vmul.f32 0.5, %v664_v40 }
 0x26e   :  { %v711_v43 = vadd.f32 1.0, %v1109_v41 }
 0x26f   :  { %1110 = vtanh.f32 %v680_v23 }
 0x270   :  { %v727_v44 = vmul.f32 0.5, %v711_v43  ;;  %v819_v43 = vadd.s32 4294967256, %v801_v31 }
 0x272   :  { %774 = vperm.xlu1 %1054, %v727_v44   ;;  %v528_v45 = vpop.xlane.xlu0 %527  ;;  %v815_v44 = vadd.s32 4294967264, %v801_v31 }
 0x273   :  { %v665_v46 = vadd.f32 %v1427_v25, %v528_v45 }
 0x275   :  { %v1111_v47 = vpop.eup %1110  ;;  %v681_v42 = vmul.f32 0.5, %v665_v46 }
 0x276   :  { %v712_v48 = vadd.f32 1.0, %v1111_v47 }
 0x277   :  { %1112 = vtanh.f32 %v681_v42 }
 0x278   :  { %v728_v50 = vmul.f32 0.5, %v712_v48 }
 0x27a   :  { %v530_v52 = vpop.xlane.xlu1 %529  ;;  %777 = vperm.xlu0 %1056, %v728_v50   ;;  %v827_v50 = vadd.s32 4294967240, %v801_v31 }
 0x27b   :  { %v666_v53 = vadd.f32 %v1446_v51, %v530_v52 }
 0x27d   :  { %v1113_v54 = vpop.eup %1112  ;;  %v682_v29 = vmul.f32 0.5, %v666_v53  ;;  %v823_v53 = vadd.s32 4294967248, %v801_v31 }
 0x27e   :  { %v713_v55 = vadd.f32 1.0, %v1113_v54  ;;  %v831_v54 = vadd.s32 4294967232, %v801_v31 }
 0x27f   :  { %1114 = vtanh.f32 %v682_v29 }
 0x280   :  { %v729_v56 = vmul.f32 0.5, %v713_v55 }
 0x282   :  { %v532_v57 = vpop.xlane.xlu2 %531  ;;  %780 = vperm.xlu2 %1055, %v729_v56  }
 0x283   :  { %v667_v59 = vadd.f32 %v1437_v39, %v532_v57 }
 0x285   :  { %v1115_v60 = vpop.eup %1114  ;;  %v683_v25 = vmul.f32 0.5, %v667_v59 }
 0x286   :  { %v714_v61 = vadd.f32 1.0, %v1115_v60 }
 0x287   :  { %1116 = vtanh.f32 %v683_v25  ;;  %v839_v25 = vadd.s32 4294967216, %v801_v31 }
 0x288   :  { %v730_v30 = vmul.f32 0.5, %v714_v61  ;;  %v835_v61 = vadd.s32 4294967224, %v801_v31 }
 0x28a   :  { %783 = vperm.xlu1 %1054, %v730_v30   ;;  %v843_v30 = vadd.s32 4294967208, %v801_v31 }
 0x28d   :  { %v1117_v62 = vpop.eup %1116 }
 0x28e   :  { %v715_v63 = vadd.f32 1.0, %v1117_v62 }
 0x290   :  { %v731_v1 = vmul.f32 0.5, %v715_v63  ;;  %v534_v2 = vpop.xlane.xlu0 %533 }
 0x291   :  { %v668_v51 = vadd.f32 %v1449_v58, %v534_v2 }
 0x292   :  { %786 = vperm.xlu0 %1056, %v731_v1  }
 0x293   :  { %v684_v34 = vmul.f32 0.5, %v668_v51 }
 0x295   :  { %1118 = vtanh.f32 %v684_v34 }
 0x298   :  { %v536_v3 = vpop.xlane.xlu1 %535 }
 0x299   :  { %v669_v4 = vadd.f32 %v1444_v49, %v536_v3 }
 0x29b   :  { %v1119_v5 = vpop.eup %1118  ;;  %v685_v39 = vmul.f32 0.5, %v669_v4 }
 0x29c   :  { %v716_v6 = vadd.f32 1.0, %v1119_v5  ;;  %v851_v5 = vadd.s32 4294967192, %v801_v31 }
 0x29d   :  { %1120 = vtanh.f32 %v685_v39  ;;  %v847_v39 = vadd.s32 4294967200, %v801_v31 }
 0x29e   :  { %v732_v7 = vmul.f32 0.5, %v716_v6 }
 0x2a0   :  { %v538_v8 = vpop.xlane.xlu2 %537  ;;  %789 = vperm.xlu2 %1055, %v732_v7  }
 0x2a1   :  { %v670_v9 = vadd.f32 %v1434_v35, %v538_v8 }
 0x2a3   :  { %v1121_v10 = vpop.eup %1120  ;;  %v686_v11 = vmul.f32 0.5, %v670_v9  ;;  %v855_v9 = vadd.s32 4294967184, %v801_v31 }
 0x2a4   :  { %v717_v12 = vadd.f32 1.0, %v1121_v10 }
 0x2a5   :  { %1122 = vtanh.f32 %v686_v11  ;;  %v859_v11 = vadd.s32 4294967176, %v801_v31 }
 0x2a6   :  { %v733_v58 = vmul.f32 0.5, %v717_v12 }
 0x2a8   :  { %792 = vperm.xlu1 %1054, %v733_v58   ;;  %v540_v13 = vpop.xlane.xlu0 %539  ;;  %v757_v27 = vpop.permute.xlu2 %756 }
 0x2a9   :  { %v671_v15 = vadd.f32 %v1451_v0, %v540_v13  ;;  %v804_v41 = vperm.slane %v757_v27, %v803_v36 }
 0x2ab   :  { %v1123_v16 = vpop.eup %1122  ;;  %v687_v49 = vmul.f32 0.5, %v671_v15 }
 0x2ac   :  { %v718_v17 = vadd.f32 1.0, %v1123_v16 }
 0x2ad   :  { %1124 = vtanh.f32 %v687_v49 }
 0x2ae   :  { %v734_v19 = vmul.f32 0.5, %v718_v17 }
 0x2b0   :  { %795 = vperm.xlu0 %1056, %v734_v19   ;;  %v754_v35 = vpop.permute.xlu1 %753 }
 0x2b1   :  { %v802_v37 = vperm.slane %v754_v35, %v801_v31 }
 0x2b3   :  { %v1125_v21 = vpop.eup %1124  ;;  %v806_v45 = vsel %vm805_vm1, %v804_v41, %v802_v37 }
 0x2b4   :  { %v719_v18 = vadd.f32 1.0, %v1125_v21  ;;  %v766_v14 = vpop.permute.xlu2 %765 }
 0x2b5   :  { %v816_v52 = vperm.slane %v766_v14, %v815_v44 }
 0x2b6   :  { %v735_v26 = vmul.f32 0.5, %v719_v18 }
 0x2b8   :  { %798 = vperm.xlu2 %1055, %v735_v26  }
 0x2bc   :  { %v760_v24 = vpop.permute.xlu1 %759 }
 0x2bd   :  { %v808_v38 = vperm.slane %v760_v24, %v807_v32 }
 0x2bf   :  { %v810_v46 = vsel %vm809_vm2, %v808_v38, %v806_v45 }
 0x2c4   :  { %v772_v33 = vpop.permute.xlu2 %771  ;;  %v763_v0 = vpop.permute.xlu0 %762 }
 0x2c5   :  { %v812_v23 = vperm.slane %v763_v0, %v811_v20  ;;  %v824_v59 = vperm.slane %v772_v33, %v823_v53 }
 0x2c7   :  { %v814_v22 = vsel %vm813_vm3, %v812_v23, %v810_v46 }
 0x2c8   :  { %v818_v29 = vsel %vm817_vm4, %v816_v52, %v814_v22 }
 0x2d4   :  { %v769_v28 = vpop.permute.xlu1 %768 }
 0x2d5   :  { %v820_v48 = vperm.slane %v769_v28, %v819_v43 }
 0x2d7   :  { %v822_v56 = vsel %vm821_vm5, %v820_v48, %v818_v29 }
 0x2d8   :  { %v826_v62 = vsel %vm825_vm6, %v824_v59, %v822_v56 }
 0x2dc   :  { %v781_v47 = vpop.permute.xlu2 %780 }
 0x2dd   :  { %v836_v3 = vperm.slane %v781_v47, %v835_v61 }
 0x2e4   :  { %v775_v40 = vpop.permute.xlu1 %774 }
 0x2e5   :  { %v828_v57 = vperm.slane %v775_v40, %v827_v50 }
 0x2e7   :  { %v830_v2 = vsel %vm829_vm7, %v828_v57, %v826_v62 }
 0x2ec   :  { %v778_v42 = vpop.permute.xlu0 %777 }
 0x2ed   :  { %v832_v60 = vperm.slane %v778_v42, %v831_v54 }
 0x2ef   :  { %v834_v51 = vsel %vm833_vm8, %v832_v60, %v830_v2 }
 0x2f0   :  { %v838_v7 = vsel %vm837_vm9, %v836_v3, %v834_v51 }
 0x2fa   :  { %v790_v63 = vpop.permute.xlu2 %789 }
 0x2fb   :  { %v848_v58 = vperm.slane %v790_v63, %v847_v39 }
 0x2fc   :  { %v784_v55 = vpop.permute.xlu1 %783 }
 0x2fd   :  { %v840_v34 = vperm.slane %v784_v55, %v839_v25 }
 0x2ff   :  { %v842_v8 = vsel %vm841_vm10, %v840_v34, %v838_v7 }
 0x304   :  { %v787_v1 = vpop.permute.xlu0 %786 }
 0x305   :  { %v844_v4 = vperm.slane %v787_v1, %v843_v30 }
 0x307   :  { %v846_v10 = vsel %vm845_vm11, %v844_v4, %v842_v8 }
 0x308   :  { %v850_v16 = vsel %vm849_vm12, %v848_v58, %v846_v10 }
 0x312   :  { %v799_v13 = vpop.permute.xlu2 %798 }
 0x313   :  { %v860_v17 = vperm.slane %v799_v13, %v859_v11 }
 0x31a   :  { %v793_v6 = vpop.permute.xlu1 %792 }
 0x31b   :  { %v852_v12 = vperm.slane %v793_v6, %v851_v5 }
 0x31d   :  { %v854_v19 = vsel %vm853_vm13, %v852_v12, %v850_v16 }
 0x322   :  { %v796_v15 = vpop.permute.xlu0 %795 }
 0x323   :  { %v856_v49 = vperm.slane %v796_v15, %v855_v9 }
 0x325   :  { %v858_v21 = vsel %vm857_vm14, %v856_v49, %v854_v19 }
 0x326   :  { %v862_v18 = vsel %vm861_vm15, %v860_v17, %v858_v21 }
 0x327   :  { %864 = vst [vmem:[#allocation7] sm:$0x1] %v862_v18 }
 0x328   :  { %875 = dma.vmem_to_hbm [thread:$0]  %s871_s19, 16, %s873_s22, [#allocation4]  }
 0x329   :  { %1202 = dma.done.wait [#allocation4], 16  }
 0x32a   :  { %1203 = vsyncadd [#allocation4], 4294967280 }
 0x32b   :  { %880 = vsyncpa [#allocation3], 1 }
 0x32c   :  { %881 = vsyncpa [#allocation6], 1 }
 0x32d   :  { %882 = vsyncpa [#allocation4], 1 }

</bundles_post_ra>
